<compile_context>
chip_gen: v7x
topology: tpu7x:2x2x1
jax: 0.10.0
libtpu: 0.0.40
codegen_flags: <defaults>
</compile_context>

<pallas_src>
import functools
import math

import jax
import jax.numpy as jnp
from jax.experimental import pallas as pl
from jax.experimental.pallas import tpu as pltpu

_STAT_LANES = 128  # lane-dense running-stat scratch (avoids masked vst on (tq, 1))


def _flash_attention_kernel(q_ref, k_ref, v_ref, o_ref,
                            m_sc, l_sc, acc_sc, *, sm_scale, compute_dtype):
    """One (batch, q_tile, kv_tile) step of online-softmax attention.

    Grid = (B, X//tq, Y//tk); batch is squeezed out of the blocks so the
    kernel works on 2-D tiles:
      q_ref : (tq, J)    k_ref : (tk, J)    v_ref : (tk, Jv)    o_ref : (tq, Jv)
      m_sc/l_sc : (tq, 128) f32 lane-broadcast running max / denominator
      acc_sc    : (tq, Jv)  f32 running numerator
    """
    kv_idx = pl.program_id(2)

    # --- init accumulators on the first kv tile ----------------------------
    @pl.when(kv_idx == 0)
    def _():
        m_sc[...] = jnp.full_like(m_sc, -jnp.inf)
        l_sc[...] = jnp.zeros_like(l_sc)
        acc_sc[...] = jnp.zeros_like(acc_sc)

    # Fold the softmax scale into q: tq*J multiplies instead of tq*tk.
    q = (q_ref[...] * sm_scale).astype(compute_dtype)
    k = k_ref[...].astype(compute_dtype)
    v = v_ref[...].astype(compute_dtype)

    # scores (tq, tk): q @ k^T on the MXU with f32 accumulation.
    s = jax.lax.dot_general(q, k, (((1,), (1,)), ((), ())),
                            preferred_element_type=jnp.float32)

    m_prev = m_sc[...]                                # (tq, 128), lane-uniform
    row_max = jnp.max(s, axis=-1, keepdims=True)      # (tq, 1)
    m_new = jnp.maximum(m_prev, row_max)              # (tq, 128), lane-uniform
    m_new_row = m_new[:, 0:1]                         # (tq, 1)

    alpha = jnp.exp(m_prev[:, 0:1] - m_new_row)       # (tq, 1) rescale of partials
    p = jnp.exp(s - m_new_row)                        # (tq, tk) unnormalized probs

    l_sc[...] = alpha * l_sc[...] + jnp.sum(p, axis=-1, keepdims=True)
    m_sc[...] = m_new
    acc_sc[...] = alpha * acc_sc[...] + jax.lax.dot_general(
        p.astype(compute_dtype), v, (((1,), (0,)), ((), ())),
        preferred_element_type=jnp.float32)

    # --- finalize on the last kv tile ---------------------------------------
    @pl.when(kv_idx == pl.num_programs(2) - 1)
    def _():
        inv_l = pl.reciprocal(l_sc[:, 0:1], approx=True)   # EUP slot, ~free
        o_ref[...] = (acc_sc[...] * inv_l).astype(o_ref.dtype)


def _pick_tile(dim, max_tile):
    """Largest tile <= max_tile that evenly divides `dim`, preferring
    lane-dense (x128) tiles, then sublane-aligned (x8) ones; falls back to
    the full extent (always legal as a full-dim block)."""
    if dim <= max_tile:
        return dim
    for align in (128, 8):
        start = max_tile - (max_tile % align)
        for t in range(start, 0, -align):
            if dim % t == 0:
                return t
    # TODO(synk): masked remainder kv tiles would bound this for awkward (prime) dims.
    return dim


def attention(querys, keys, values, *, q_tile=512, kv_tile=256, mxu_dtype=None):
    """JAX/Pallas equivalent of the PyTorch `attention` module's forward.

    mxu_dtype=jnp.bfloat16 casts the matmul operands (not the softmax stats or
    accumulators) for v6e/v7x MXU throughput; default None keeps exact input
    precision for the matmuls.
    """
    B, X, J = querys.shape
    Bk, Y, Jk = keys.shape
    Bv, Yv, Jv = values.shape
    assert (B, J) == (Bk, Jk) and (Bk, Y) == (Bv, Yv), "shape mismatch"

    sm_scale = 1.0 / math.sqrt(float(J))
    compute_dtype = jnp.dtype(mxu_dtype) if mxu_dtype is not None else jnp.dtype(querys.dtype)

    tq = _pick_tile(X, q_tile)
    tk = _pick_tile(Y, kv_tile)
    grid = (B, X // tq, Y // tk)

    # VMEM budget: double-buffered Q/K/V/O blocks + resident f32 scratch,
    # floored at 32 MiB (v5e scoped default is 16), capped at 64 MiB (v7x).
    in_itemsize = jnp.dtype(querys.dtype).itemsize
    out_itemsize = in_itemsize
    block_bytes = (tq * J + tk * J + tk * Jv + tq * Jv) * in_itemsize
    scratch_bytes = (2 * tq * _STAT_LANES + tq * Jv) * 4
    budget = 2 * block_bytes + scratch_bytes + (4 << 20)
    vmem_limit = int(min(max(budget, 32 << 20), 64 << 20))

    kernel = functools.partial(_flash_attention_kernel,
                               sm_scale=sm_scale, compute_dtype=compute_dtype)

    flops = 2 * B * X * Y * J + 2 * B * X * Y * Jv
    bytes_accessed = (querys.size + keys.size + values.size) * in_itemsize \
        + B * X * Jv * out_itemsize

    return pl.pallas_call(
        kernel,
        out_shape=jax.ShapeDtypeStruct((B, X, Jv), querys.dtype),
        grid_spec=pltpu.PrefetchScalarGridSpec(
            num_scalar_prefetch=0,
            grid=grid,
            in_specs=[
                pl.BlockSpec((pl.Squeezed(), tq, J),
                             lambda b, qi, ki: (b, qi, 0)),   # Q
                pl.BlockSpec((pl.Squeezed(), tk, J),
                             lambda b, qi, ki: (b, ki, 0)),   # K
                pl.BlockSpec((pl.Squeezed(), tk, Jv),
                             lambda b, qi, ki: (b, ki, 0)),   # V
            ],
            out_specs=pl.BlockSpec((pl.Squeezed(), tq, Jv),
                                   lambda b, qi, ki: (b, qi, 0)),
            scratch_shapes=[
                pltpu.VMEM((tq, _STAT_LANES), jnp.float32),   # running max m
                pltpu.VMEM((tq, _STAT_LANES), jnp.float32),   # running denom l
                pltpu.VMEM((tq, Jv), jnp.float32),            # running numerator
            ],
        ),
        compiler_params=pltpu.CompilerParams(
            dimension_semantics=("parallel", "parallel", "arbitrary"),
            vmem_limit_bytes=vmem_limit,
        ),
        cost_estimate=pl.CostEstimate(
            flops=flops,
            transcendentals=B * X * Y,
            bytes_accessed=bytes_accessed,
        ),
    )(querys, keys, values)


def attention_ref(q, k, v):
    s = jnp.einsum('bxj,byj->bxy', q, k) / math.sqrt(float(k.shape[-1]))
    w = jax.nn.softmax(s, axis=2)
    return jnp.einsum('bxy,byj->bxj', w, v)


if __name__ == "__main__":
    key = jax.random.PRNGKey(0)
    kq, kk, kvv, kq2, kk2, kv2 = jax.random.split(key, 6)

    # Small shapes implied by the module: q (B, X, J), k/v (B, Y, J).
    B, X, Y, J = 2, 16, 16, 32
    q = jax.random.normal(kq, (B, X, J), dtype=jnp.float32)
    k = jax.random.normal(kk, (B, Y, J), dtype=jnp.float32)
    v = jax.random.normal(kvv, (B, Y, J), dtype=jnp.float32)

    out = attention(q, k, v)
    jax.block_until_ready(out)
    ref = attention_ref(q, k, v)
    assert out.shape == ref.shape and out.dtype == ref.dtype
    assert jnp.allclose(out, ref, atol=2e-3, rtol=2e-3)

    # Tiled online-softmax path: batch/q-tile parallel axes and kv reduction
    # axis all > 1 (grid = (2, 2, 3)).
    B2, X2, Y2, J2 = 2, 512, 384, 128
    q2 = jax.random.normal(kq2, (B2, X2, J2), dtype=jnp.float32)
    k2 = jax.random.normal(kk2, (B2, Y2, J2), dtype=jnp.float32)
    v2 = jax.random.normal(kv2, (B2, Y2, J2), dtype=jnp.float32)

    out2 = attention(q2, k2, v2, q_tile=256, kv_tile=128)
    jax.block_until_ready(out2)
    ref2 = attention_ref(q2, k2, v2)
    assert jnp.allclose(out2, ref2, atol=2e-3, rtol=2e-3)

    # Optional bf16-operand MXU path (v6e/v7x throughput knob); softmax stats
    # and accumulation stay f32, so tolerance is the usual bf16-flash level.
    out3 = attention(q2, k2, v2, q_tile=256, kv_tile=128, mxu_dtype=jnp.bfloat16)
    jax.block_until_ready(out3)
    assert jnp.allclose(out3, ref2, atol=5e-2, rtol=5e-2)

    print("KERNEL_OK")
</pallas_src>

<mosaic_0001>
module attributes {stable_mosaic.version = 11 : i64} {
  func.func @_flash_attention_kernel(%arg0: i32, %arg1: i32, %arg2: i32, %arg3: memref<1x16x32xf32, #tpu.memory_space<vmem>>, %arg4: memref<1x16x32xf32, #tpu.memory_space<vmem>>, %arg5: memref<1x16x32xf32, #tpu.memory_space<vmem>>, %arg6: memref<1x16x32xf32, #tpu.memory_space<vmem>>, %arg7: memref<16x128xf32, #tpu.memory_space<vmem>>, %arg8: memref<16x128xf32, #tpu.memory_space<vmem>>, %arg9: memref<16x32xf32, #tpu.memory_space<vmem>>) attributes {dimension_semantics = [#tpu.dimension_semantics<parallel>, #tpu.dimension_semantics<parallel>, #tpu.dimension_semantics<arbitrary>], iteration_bounds = array<i64: 2, 1, 1>, scalar_prefetch = 0 : i64, scratch_operands = 3 : i64, tpu.core_type = #tpu.core_type<tc>, window_params = [{transform_indices = @transform_0, window_bounds = array<i64: 1, 16, 32>}, {transform_indices = @transform_1, window_bounds = array<i64: 1, 16, 32>}, {transform_indices = @transform_2, window_bounds = array<i64: 1, 16, 32>}, {transform_indices = @transform_3, window_bounds = array<i64: 1, 16, 32>}]} {
    %c0_i32 = arith.constant 0 : i32
    %0 = arith.cmpi eq, %arg2, %c0_i32 : i32
    %1 = arith.extui %0 : i1 to i32
    %c0_i32_0 = arith.constant 0 : i32
    %2 = arith.cmpi ne, %1, %c0_i32_0 : i32
    scf.if %2 {
      %cst_27 = arith.constant 0xFF800000 : f32
      %42 = vector.broadcast %cst_27 : f32 to vector<16x128xf32>
      %c0_28 = arith.constant 0 : index
      %c0_29 = arith.constant 0 : index
      %43 = vector.load %arg7[%c0_28, %c0_29] : memref<16x128xf32, #tpu.memory_space<vmem>>, vector<16x128xf32>
      tpu.vector_store %arg7[%c0_28, %c0_29], %42 {strides = array<i32>} : memref<16x128xf32, #tpu.memory_space<vmem>>, vector<16x128xf32>,
      %cst_30 = arith.constant 0.000000e+00 : f32
      %44 = vector.broadcast %cst_30 : f32 to vector<16x128xf32>
      %c0_31 = arith.constant 0 : index
      %c0_32 = arith.constant 0 : index
      %45 = vector.load %arg8[%c0_31, %c0_32] : memref<16x128xf32, #tpu.memory_space<vmem>>, vector<16x128xf32>
      tpu.vector_store %arg8[%c0_31, %c0_32], %44 {strides = array<i32>} : memref<16x128xf32, #tpu.memory_space<vmem>>, vector<16x128xf32>,
      %cst_33 = arith.constant 0.000000e+00 : f32
      %46 = vector.broadcast %cst_33 : f32 to vector<16x32xf32>
      %c0_34 = arith.constant 0 : index
      %c0_35 = arith.constant 0 : index
      %47 = vector.load %arg9[%c0_34, %c0_35] : memref<16x32xf32, #tpu.memory_space<vmem>>, vector<16x32xf32>
      tpu.vector_store %arg9[%c0_34, %c0_35], %46 {strides = array<i32>} : memref<16x32xf32, #tpu.memory_space<vmem>>, vector<16x32xf32>,
    } else {
    }
    %c0 = arith.constant 0 : index
    %c0_1 = arith.constant 0 : index
    %c0_2 = arith.constant 0 : index
    %3 = vector.load %arg3[%c0, %c0_1, %c0_2] : memref<1x16x32xf32, #tpu.memory_space<vmem>>, vector<1x16x32xf32>
    %4 = vector.shape_cast %3 : vector<1x16x32xf32> to vector<16x32xf32>
    %cst = arith.constant 0.176776692 : f32
    %5 = vector.broadcast %cst : f32 to vector<16x32xf32>
    %6 = arith.mulf %4, %5 : vector<16x32xf32>
    %c0_3 = arith.constant 0 : index
    %c0_4 = arith.constant 0 : index
    %c0_5 = arith.constant 0 : index
    %7 = vector.load %arg4[%c0_3, %c0_4, %c0_5] : memref<1x16x32xf32, #tpu.memory_space<vmem>>, vector<1x16x32xf32>
    %8 = vector.shape_cast %7 : vector<1x16x32xf32> to vector<16x32xf32>
    %c0_6 = arith.constant 0 : index
    %c0_7 = arith.constant 0 : index
    %c0_8 = arith.constant 0 : index
    %9 = vector.load %arg5[%c0_6, %c0_7, %c0_8] : memref<1x16x32xf32, #tpu.memory_space<vmem>>, vector<1x16x32xf32>
    %10 = vector.shape_cast %9 : vector<1x16x32xf32> to vector<16x32xf32>
    %cst_9 = arith.constant dense<0.000000e+00> : vector<16x16xf32>
    %11 = tpu.matmul %6, %8, %cst_9 {dimension_numbers = #tpu.dot_dimension_numbers<[1], [1], [0], [0], [0, 0, 1, 0], [], []>} : vector<16x32xf32>, vector<16x32xf32>, vector<16x16xf32> -> vector<16x16xf32>
    %c0_10 = arith.constant 0 : index
    %c0_11 = arith.constant 0 : index
    %12 = vector.load %arg7[%c0_10, %c0_11] : memref<16x128xf32, #tpu.memory_space<vmem>>, vector<16x128xf32>
    %cst_12 = arith.constant dense<0xFF800000> : vector<16xf32>
    %13 = vector.multi_reduction <maximumf>, %11, %cst_12 [1] : vector<16x16xf32> to vector<16xf32>
    %14 = vector.shape_cast %13 : vector<16xf32> to vector<16x1xf32>
    %15 = vector.broadcast %14 : vector<16x1xf32> to vector<16x128xf32>
    %16 = arith.maximumf %12, %15 : vector<16x128xf32>
    %17 = vector.extract_strided_slice %16 {offsets = [0, 0], sizes = [16, 1], strides = [1, 1]} : vector<16x128xf32> to vector<16x1xf32>
    %18 = vector.extract_strided_slice %12 {offsets = [0, 0], sizes = [16, 1], strides = [1, 1]} : vector<16x128xf32> to vector<16x1xf32>
    %19 = arith.subf %18, %17 : vector<16x1xf32>
    %20 = math.exp %19 : vector<16x1xf32>
    %21 = vector.broadcast %17 : vector<16x1xf32> to vector<16x16xf32>
    %22 = arith.subf %11, %21 : vector<16x16xf32>
    %23 = math.exp %22 : vector<16x16xf32>
    %c0_13 = arith.constant 0 : index
    %c0_14 = arith.constant 0 : index
    %24 = vector.load %arg8[%c0_13, %c0_14] : memref<16x128xf32, #tpu.memory_space<vmem>>, vector<16x128xf32>
    %25 = vector.broadcast %20 : vector<16x1xf32> to vector<16x128xf32>
    %26 = arith.mulf %25, %24 : vector<16x128xf32>
    %cst_15 = arith.constant dense<0.000000e+00> : vector<16xf32>
    %27 = vector.multi_reduction <add>, %23, %cst_15 [1] : vector<16x16xf32> to vector<16xf32>
    %28 = vector.shape_cast %27 : vector<16xf32> to vector<16x1xf32>
    %29 = vector.broadcast %28 : vector<16x1xf32> to vector<16x128xf32>
    %30 = arith.addf %26, %29 : vector<16x128xf32>
    %c0_16 = arith.constant 0 : index
    %c0_17 = arith.constant 0 : index
    %31 = vector.load %arg8[%c0_16, %c0_17] : memref<16x128xf32, #tpu.memory_space<vmem>>, vector<16x128xf32>
    tpu.vector_store %arg8[%c0_16, %c0_17], %30 {strides = array<i32>} : memref<16x128xf32, #tpu.memory_space<vmem>>, vector<16x128xf32>,
    %c0_18 = arith.constant 0 : index
    %c0_19 = arith.constant 0 : index
    %32 = vector.load %arg7[%c0_18, %c0_19] : memref<16x128xf32, #tpu.memory_space<vmem>>, vector<16x128xf32>
    tpu.vector_store %arg7[%c0_18, %c0_19], %16 {strides = array<i32>} : memref<16x128xf32, #tpu.memory_space<vmem>>, vector<16x128xf32>,
    %c0_20 = arith.constant 0 : index
    %c0_21 = arith.constant 0 : index
    %33 = vector.load %arg9[%c0_20, %c0_21] : memref<16x32xf32, #tpu.memory_space<vmem>>, vector<16x32xf32>
    %34 = vector.broadcast %20 : vector<16x1xf32> to vector<16x32xf32>
    %35 = arith.mulf %34, %33 : vector<16x32xf32>
    %cst_22 = arith.constant dense<0.000000e+00> : vector<16x32xf32>
    %36 = tpu.matmul %23, %10, %cst_22 {dimension_numbers = #tpu.dot_dimension_numbers<[1], [0], [0], [1], [0, 0, 1, 1], [], []>} : vector<16x16xf32>, vector<16x32xf32>, vector<16x32xf32> -> vector<16x32xf32>
    %37 = arith.addf %35, %36 : vector<16x32xf32>
    %c0_23 = arith.constant 0 : index
    %c0_24 = arith.constant 0 : index
    %38 = vector.load %arg9[%c0_23, %c0_24] : memref<16x32xf32, #tpu.memory_space<vmem>>, vector<16x32xf32>
    tpu.vector_store %arg9[%c0_23, %c0_24], %37 {strides = array<i32>} : memref<16x32xf32, #tpu.memory_space<vmem>>, vector<16x32xf32>,
    %c0_i32_25 = arith.constant 0 : i32
    %39 = arith.cmpi eq, %arg2, %c0_i32_25 : i32
    %40 = arith.extui %39 : i1 to i32
    %c0_i32_26 = arith.constant 0 : i32
    %41 = arith.cmpi ne, %40, %c0_i32_26 : i32
    scf.if %41 {
      %c0_27 = arith.constant 0 : index
      %c0_28 = arith.constant 0 : index
      %42 = vector.load %arg8[%c0_27, %c0_28] : memref<16x128xf32, #tpu.memory_space<vmem>>, vector<16x1xf32>
      %43 = tpu.reciprocal %42 {approx = true} : vector<16x1xf32> -> vector<16x1xf32>
      %c0_29 = arith.constant 0 : index
      %c0_30 = arith.constant 0 : index
      %44 = vector.load %arg9[%c0_29, %c0_30] : memref<16x32xf32, #tpu.memory_space<vmem>>, vector<16x32xf32>
      %45 = vector.broadcast %43 : vector<16x1xf32> to vector<16x32xf32>
      %46 = arith.mulf %44, %45 : vector<16x32xf32>
      %c0_31 = arith.constant 0 : index
      %c0_32 = arith.constant 0 : index
      %c0_33 = arith.constant 0 : index
      %47 = vector.load %arg6[%c0_31, %c0_32, %c0_33] : memref<1x16x32xf32, #tpu.memory_space<vmem>>, vector<1x16x32xf32>
      %48 = vector.shape_cast %47 : vector<1x16x32xf32> to vector<16x32xf32>
      %49 = vector.shape_cast %46 : vector<16x32xf32> to vector<1x16x32xf32>
      tpu.vector_store %arg6[%c0_31, %c0_32, %c0_33], %49 {strides = array<i32>} : memref<1x16x32xf32, #tpu.memory_space<vmem>>, vector<1x16x32xf32>,
    } else {
    }
    return
  }
  func.func @transform_0(%arg0: i32, %arg1: i32, %arg2: i32) -> (i32, i32, i32) {
    %c0_i32 = arith.constant 0 : i32
    %c0_i32_0 = arith.constant 0 : i32
    return %arg0, %arg1, %c0_i32 : i32, i32, i32
  }
  func.func @transform_1(%arg0: i32, %arg1: i32, %arg2: i32) -> (i32, i32, i32) {
    %c0_i32 = arith.constant 0 : i32
    %c0_i32_0 = arith.constant 0 : i32
    return %arg0, %arg2, %c0_i32 : i32, i32, i32
  }
  func.func @transform_2(%arg0: i32, %arg1: i32, %arg2: i32) -> (i32, i32, i32) {
    %c0_i32 = arith.constant 0 : i32
    %c0_i32_0 = arith.constant 0 : i32
    return %arg0, %arg2, %c0_i32 : i32, i32, i32
  }
  func.func @transform_3(%arg0: i32, %arg1: i32, %arg2: i32) -> (i32, i32, i32) {
    %c0_i32 = arith.constant 0 : i32
    %c0_i32_0 = arith.constant 0 : i32
    return %arg0, %arg1, %c0_i32 : i32, i32, i32
  }
}

</mosaic_0001>

<bundles_post_ra>
// kernel: tpu_custom_call.1
= control target key start
LH: loop header
LB: loop body
LE: loop exit
PB: predicated region body
PF: predicated region fallthrough
CT: control target
= control target key end

     0   :  { %s1401_s0 = inlined_call_operand.hbm [shape: f32[2,16,32], index: 0, kind: input, shape index: {}]   ;;  %s1402_s1 = inlined_call_operand.hbm [shape: f32[2,16,32], index: 1, kind: input, shape index: {}]   ;;  %s1403_s2 = inlined_call_operand.hbm [shape: f32[2,16,32], index: 2, kind: input, shape index: {}]   ;;  %s1404_s3 = inlined_call_operand.hbm [shape: f32[2,16,32], index: 3, kind: output, shape index: {}]  }
   0x1   :  { %1414 = sst [smem:[#allocation18_spill]] %s1402_s1 }
   0x2   :  { %8 = vsyncpa [#allocation6], 0 }
   0x3   :  { %10 = vsyncpa [#allocation6 + $0x1], 0 }
   0x4   :  { %11 = vsyncpa [#allocation9], 0 }
   0x5   :  { %13 = vsyncpa [#allocation9 + $0x1], 0 }
   0x6   :  { %14 = vsyncpa [#allocation7], 0 }
   0x7   :  { %16 = vsyncpa [#allocation7 + $0x1], 0  ;;  %s1101_s12 = smov 0   ;;  %s1103_s13 = smov 0  }
   0x8   :  { %s1105_s14 = smov 0   ;;  %s1107_s15 = smov 0  }
   0x9   :  { %s1109_s16 = smov 0   ;;  %s1111_s17 = smov 0  }
   0xa LB: > { %1415 = sst [smem:[#allocation15_spill]] %s1065_s16  ;;  %s1132_s18 = sadd.s32 4294967295, %s1069_s17   ;;  %s1069_s17 = sphi %s1111_s17, %s22_s17   ;;  %s1065_s16 = sphi %s1109_s16, %s1438_s16   ;;  %s1061_s15 = sphi %s1107_s15, %s1437_s15   ;;  %s1057_s14 = sphi %s1105_s14, %s1441_s14   ;;  %s1053_s13 = sphi %s1103_s13, %s1440_s13   ;;  %s1049_s12 = sphi %s1101_s12, %s1439_s12  }
   0xb   : > { %s737_s19 = sadd.s32 4294967294, %s1069_s17   ;;  %s41_s20 = sadd.s32 1, %s1065_s16 }
   0xc   : > { %s50_s21 = sadd.s32 1, %s1057_s14  ;;  %p43_p0 = scmp.ge.s32.totalorder %s41_s20, 2 }
   0xd   : > { %p57_p1 = scmp.ne.s32.totalorder %s1057_s14, %s1053_s13  ;;  %p58_p2 = scmp.eq.s32.totalorder %s1069_s17, 0 }
   0xe   : > { %p63_p3 = scmp.ne.s32.totalorder %s1053_s13, %s1049_s12  ;;  %s1443_s20 = smov (%p43_p0, %s41_s20), 0 }
   0xf   : > { %1416 = sst [smem:[#allocation16_spill]] %s1443_s20  ;;  %p1144_p4 = por %p58_p2, %p57_p1 }
  0x10   : > { %p64_p5 = scmp.eq.s32.totalorder %s1132_s18, 0  ;;  %s45_s23 = ssub.s32 %s1065_s16, %s1443_s20 }
  0x11   : > { %p145_p6 = scmp.eq.s32.totalorder %s1132_s18, 1  ;;  %p48_p7 = scmp.eq.s32.totalorder %s45_s23, 0 }
  0x12   : > { %p1152_p8 = por %p64_p5, %p63_p3  ;;  %p151_p10 = scmp.eq.s32.totalorder %s737_s19, 1 }
  0x13   : > { %p1156_p9 = por %p145_p6, %p57_p1  ;;  %p823_p13 = scmp.lt.s32.totalorder %s1069_s17, 2 }
  0x14   : > { %s1418_s24 = scalar_select %p1152_p8, 1, 0 }
  0x15   : > { %s1419_s25 = scalar_select %p1156_p9, 1, 0 }
  0x16   : > { %s1161_s26 = scalar_select %p48_p7, %s1057_s14, %s50_s21  }
  0x17   : > { %p1163_p11 = por %p151_p10, %p63_p3  ;;  %s1407_s28 = sand.u32 1, %s1057_s14  }
  0x18   : > { %1420 = sst [smem:[#allocation17_spill]] %s1161_s26  ;;  %s1172_s29 = sshll.u32 %s1407_s28, 4 }
  0x19   : > { %s1421_s27 = scalar_select %p1163_p11, 1, 0 }
  0x1a   : > { %s1175_s30 = sshll.u32 %s1065_s16, 8  ;;  %p1179_p0 = pnand %p823_p13, %p1144_p4 }
  0x1b   : > { %s194_s5 = sand.u32 1, %s1069_s17   ;;  %s1423_s1 = sld [smem:[#allocation18_spill]] }
  0x1c   : > { %s198_s9 = scalar_lea.vmem [#allocation8], %s1172_s29  ;;  %s1195_s11 = scalar_lea.sflag [#allocation9], %s194_s5 }
  0x1d   : > { %s207_s10 = sshll.u32 %s198_s9, 4  ;;  %p1201_p4 = pneg %p1179_p0  ;;  %s1192_s10 = int_to_ptr.vmem [resolvable:$true] %s207_s10 }
  0x21   : > { %s1188_s8 = scalar_lea.hbm %s1423_s1, %s1175_s30  ;;  %s898_s6 = scalar_lea.hbm %s1423_s1, 512 }
  0x22   : > { %s893_s19 = scalar_lea.hbm %s1188_s8, 256  ;;  %p899_p7 = scmp.lt.u32.totalorder %s1188_s8, %s1423_s1 }
  0x23   : > { %p894_p3 = scmp.ne.s32.totalorder %s1188_s8, %s893_s19  ;;  %p900_p10 = scmp.lt.u32.totalorder %s898_s6, %s893_s19 }
  0x24   : > { %p902_p12 = scmp.lt.u32.totalorder %s893_s19, %s1188_s8 }
  0x25   : > { %p896_p5 = pnand %p1201_p4, %p894_p3  ;;  %p901_p13 = por %p900_p10, %p899_p7 }
  0x27   : > { %p897_p6 = pneg %p896_p5  ;;  %p903_p1 = por %p902_p12, %p901_p13 }
  0x29   : > { %p904_p2 = pnand %p903_p1, %p897_p6 }
  0x2b   : > { %907 = shalt.err (!%p904_p2)
}
  0x2c   : > { %s908_s5 = scalar_lea.vmem %s1192_s10, 256  ;;  %s1071_s22 = smov [#allocation8]  }
  0x2d   : > { %p909_p3 = scmp.ne.s32.totalorder %s1192_s10, %s908_s5  ;;  %s913_s23 = sshll.u32 %s1071_s22, 4  ;;  %s914_s23 = int_to_ptr.vmem [resolvable:$false] %s913_s23 }
  0x2e   : > { %s915_s7 = scalar_lea.vmem %s914_s23, 512  ;;  %p916_p9 = scmp.lt.s32.totalorder %s1192_s10, %s914_s23 }
  0x2f   : > { %p911_p5 = pnand %p909_p3, %p1201_p4  ;;  %p917_p8 = scmp.lt.s32.totalorder %s915_s7, %s908_s5 }
  0x31   : > { %p912_p11 = pneg %p911_p5  ;;  %p918_p7 = por %p917_p8, %p916_p9 }
  0x33   : > { %p919_p10 = pnand %p918_p7, %p912_p11 }
  0x35   : > { %922 = shalt.err (!%p919_p10)
}
  0x36   : > { %s1408_s19 = smov 128   ;;  %s1410_s6 = smov 8  }
  0x37   : > { %815 = dma.hbm_to_vmem [thread:$0]  (!%p1179_p0), %s1188_s8, 256, %s1192_s10, %s1195_s11, %s1408_s19, %s1408_s19, %s1410_s6  }
  0x38   : > { %p1425_p8 = scmp.lt.s32.totalorder %s1069_s17, 3  ;;  %p1426_p9 = scmp.ge.s32.totalorder %s1069_s17, 1 }
  0x39   : > { %s1240_s23 = scalar_lea.hbm %s1401_s0, %s1175_s30  ;;  %s175_s7 = scalar_lea.vmem [#allocation5], %s1172_s29 }
  0x3a   : > { %p1232_p11 = pnand %p1426_p9, %p1425_p8  ;;  %s184_s28 = sshll.u32 %s175_s7, 4  ;;  %s1243_s28 = int_to_ptr.vmem [resolvable:$true] %s184_s28 }
  0x3b   : > { %s1249_s19 = scalar_lea.hbm %s1403_s2, %s1175_s30  ;;  %s1428_s6 = sand.u32 1, %s1057_s14  }
  0x3c   : > { %s1427_s9 = scalar_select %p1232_p11, 1, 0 }
  0x3d   : > { %s1253_s1 = scalar_lea.sflag [#allocation6], %s1428_s6  ;;  %s923_s20 = scalar_lea.hbm %s1240_s23, 256 }
  0x3e   : > { %p924_p12 = scmp.ne.s32.totalorder %s1240_s23, %s923_s20  ;;  %s928_s16 = scalar_lea.hbm %s1401_s0, 512 }
  0x3f   : > { %p929_p6 = scmp.lt.u32.totalorder %s1240_s23, %s1401_s0  ;;  %p930_p13 = scmp.lt.u32.totalorder %s928_s16, %s923_s20 }
  0x40   : > { %p926_p1 = pnand %p924_p12, %p1201_p4  ;;  %p932_p5 = scmp.lt.u32.totalorder %s923_s20, %s1240_s23 }
  0x41   : > { %p931_p3 = por %p930_p13, %p929_p6 }
  0x42   : > { %p927_p2 = pneg %p926_p1 }
  0x43   : > { %p933_p7 = por %p932_p5, %p931_p3 }
  0x45   : > { %p934_p10 = pnand %p933_p7, %p927_p2 }
  0x47   : > { %937 = shalt.err (!%p934_p10)
}
  0x48   : > { %s938_s30 = scalar_lea.vmem %s1243_s28, 256  ;;  %s1074_s6 = smov [#allocation5]  }
  0x49   : > { %p939_p8 = scmp.ne.s32.totalorder %s1243_s28, %s938_s30  ;;  %s943_s8 = sshll.u32 %s1074_s6, 4  ;;  %s944_s8 = int_to_ptr.vmem [resolvable:$false] %s943_s8 }
  0x4a   : > { %s945_s26 = scalar_lea.vmem %s944_s8, 512  ;;  %p946_p1 = scmp.lt.s32.totalorder %s1243_s28, %s944_s8 }
  0x4b   : > { %p941_p9 = pnand %p939_p8, %p1201_p4  ;;  %p947_p11 = scmp.lt.s32.totalorder %s945_s26, %s938_s30 }
  0x4d   : > { %p942_p12 = pneg %p941_p9  ;;  %p948_p6 = por %p947_p11, %p946_p1 }
  0x4f   : > { %p949_p13 = pnand %p948_p6, %p942_p12 }
  0x51   : > { %952 = shalt.err (!%p949_p13)
}
  0x52   : > { %s1429_s16 = smov 8   ;;  %s1430_s20 = smov 128  }
  0x53   : > { %812 = dma.hbm_to_vmem [thread:$0]  (!%p1179_p0), %s1240_s23, 256, %s1243_s28, %s1253_s1, %s1430_s20, %s1430_s20, %s1429_s16  }
  0x54   : > { %s221_s10 = scalar_lea.vmem [#allocation10], %s1172_s29  ;;  %s953_s22 = scalar_lea.hbm %s1249_s19, 256 }
  0x55   : > { %s230_s5 = sshll.u32 %s221_s10, 4  ;;  %p954_p11 = scmp.ne.s32.totalorder %s1249_s19, %s953_s22  ;;  %s1281_s5 = int_to_ptr.vmem [resolvable:$true] %s230_s5 }
  0x56   : > { %s958_s6 = scalar_lea.hbm %s1403_s2, 512  ;;  %p959_p5 = scmp.lt.u32.totalorder %s1249_s19, %s1403_s2 }
  0x57   : > { %p956_p2 = pnand %p954_p11, %p1201_p4  ;;  %p960_p7 = scmp.lt.u32.totalorder %s958_s6, %s953_s22 }
  0x58   : > { %p962_p8 = scmp.lt.u32.totalorder %s953_s22, %s1249_s19 }
  0x59   : > { %p957_p3 = pneg %p956_p2  ;;  %p961_p10 = por %p960_p7, %p959_p5 }
  0x5b   : > { %p963_p9 = por %p962_p8, %p961_p10 }
  0x5d   : > { %p964_p12 = pnand %p963_p9, %p957_p3 }
  0x5f   : > { %967 = shalt.err (!%p964_p12)
}
  0x60   : > { %s968_s1 = scalar_lea.vmem %s1281_s5, 256  ;;  %s1075_s28 = smov [#allocation10]  }
  0x61   : > { %p969_p1 = scmp.ne.s32.totalorder %s1281_s5, %s968_s1  ;;  %s973_s29 = sshll.u32 %s1075_s28, 4  ;;  %s974_s29 = int_to_ptr.vmem [resolvable:$false] %s973_s29 }
  0x62   : > { %s975_s23 = scalar_lea.vmem %s974_s29, 512  ;;  %p976_p11 = scmp.lt.s32.totalorder %s1281_s5, %s974_s29 }
  0x63   : > { %p971_p6 = pnand %p969_p1, %p1201_p4  ;;  %p977_p2 = scmp.lt.s32.totalorder %s975_s23, %s968_s1 }
  0x65   : > { %p972_p13 = pneg %p971_p6  ;;  %p978_p5 = por %p977_p2, %p976_p11 }
  0x67   : > { %p979_p7 = pnand %p978_p5, %p972_p13 }
  0x69   : > { %982 = shalt.err (!%p979_p7)
}
  0x6a   : > { %818 = dma.hbm_to_vmem [thread:$0]  (!%p1179_p0), %s1249_s19, 256, %s1281_s5, %s1195_s11, %s1430_s20, %s1430_s20, %s1429_s16  }
  0x6b   : > { %p1431_p4 = scmp.ne.s32.totalorder %s1427_s9, 0 }
  0x6c   : > { %s1311_s21 = sand.u32 (!%p1431_p4), 1, %s1053_s13   ;;  %p1432_p3 = scmp.ne.s32.totalorder (!%p1431_p4), %s1418_s24, 0 }
  0x6d   : > { %242 = sbr.rel (%p1431_p4) target bundleno = 945 (0x3b1), region = 32  ;;  %s1314_s10 = sshll.u32 (!%p1431_p4), %s1311_s21, 4 }
  0x6e   : > { %s245_s4 = scalar_lea.sflag (!%p1431_p4), [#allocation6], %s1311_s21  ;;  %s248_s22 = scalar_lea.vmem (!%p1431_p4), [#allocation5], %s1314_s10 }
  0x74   : > { %1036 = dma.done.wait (%p1432_p3), %s245_s4, 256  }
  0x75   : > { %1038 = vsyncadd (%p1432_p3), %s245_s4, 4294967040  ;;  %s253_s11 = sand.u32 1, %s1132_s18   ;;  %s257_s9 = scalar_lea.vmem [#allocation8], %s1314_s10 }
  0x76   : > { %s254_s19 = scalar_lea.sflag [#allocation9], %s253_s11 }
  0x77   : > { %1040 = dma.done.wait (%p1432_p3), %s254_s19, 512  }
  0x78   : > { %1042 = vsyncadd (%p1432_p3), %s254_s19, 4294966784  ;;  %vm311_vm0 = vcmask 261120   ;;  %v318_v0 = vld [vmem:[%s257_s9] sm:$0xff]  ;;  %v319_v1 = vld [vmem:[%s257_s9 + $0x8] sm:$0xff]  ;;  %v1076_v7 = vmov 0   ;;  %vm412_vm2 = vcmask 130048  }
  0x79   : > { %vm792_vm1 = vmpackc.low %vm311_vm0, %vm311_vm0  ;;  %v314_v2 = vld [vmem:[%s248_s22] sm:$0xff]  ;;  %v791_v3 = vpack.c.bf16 %v319_v1, %v318_v0  ;;  %v315_v5 = vld [vmem:[%s248_s22 + $0x8] sm:$0xff]  ;;  %879 = vset.pattern.permute.xlu1 %v1076_v7  ;;  %880 = vset.pattern.permute.xlu0 %v1076_v7  ;;  %s266_s18 = scalar_lea.vmem [#allocation10], %s1314_s10  ;;  %v1077_v31 = vmov 0.0   ;;  %s298_s24 = scalar_lea.vmem [#allocation11], %s1314_s10 }
  0x7a   : > { %v316_v4 = vmul.f32 0.17677669, %v314_v2  ;;  %v317_v6 = vmul.f32 0.17677669, %v315_v5  ;;  %v320_v14 = vld [vmem:[%s266_s18] sm:$0xff]  ;;  %v321_v15 = vld [vmem:[%s266_s18 + $0x8] sm:$0xff] }
  0x7b   : > { %793 = vmatprep.subr.msk.bf16.mxu0 %vm792_vm1, %v791_v3  ;;  %v797_v16 = vpack.c.bf16 %v321_v15, %v320_v14  ;;  %312 = vst.msk [vmem:[#allocation4] sm:$0xff] %vm311_vm0, %v1077_v31  ;;  %313 = vst.msk [vmem:[#allocation4 + $0x8] sm:$0xff] %vm311_vm0, %v1077_v31  ;;  %s597_s16 = sshll.u32 %s298_s24, 4  ;;  %s768_s20 = sshll.u32 %s1061_s15, 8  ;;  %s1345_s16 = int_to_ptr.vmem [resolvable:$true] %s597_s16 }
  0x7c   : > { %781 = vmatprep.mubr.msk.f32.mxu0 %vm311_vm0, %v316_v4  ;;  %796 = vmatpush3.bf16.xpose.msk.msra.mxu0 %vm792_vm1, %v791_v3  ;;  %s1351_s30 = scalar_lea.hbm %s1404_s3, %s768_s20  ;;  %s582_s6 = scalar_lea.sflag [#allocation7], %s1311_s21 }
  0x7d   : > { %798 = vmatprep.subr.bf16.mxu1 %v797_v16  ;;  %s983_s8 = scalar_lea.vmem %s1345_s16, 256  ;;  %p1433_p10 = scmp.ne.s32.totalorder %s1419_s25, 0 }
  0x7e   : > { %800 = vmatpush3.bf16.msra.mxu1 %v797_v16  ;;  %p984_p0 = scmp.ne.s32.totalorder %s1345_s16, %s983_s8  ;;  %s1078_s15 = smov [#allocation11]  }
  0x7f   : > { %s987_s26 = sshll.u32 %s1078_s15, 4  ;;  %s988_s26 = int_to_ptr.vmem [resolvable:$false] %s987_s26 }
  0x80   : > { %p985_p8 = pnand %p984_p0, %p1433_p10  ;;  %s989_s1 = scalar_lea.vmem %s988_s26, 512 }
  0x81   : > { %p990_p12 = scmp.lt.s32.totalorder %s1345_s16, %s988_s26  ;;  %p991_p1 = scmp.lt.s32.totalorder %s989_s1, %s983_s8 }
  0x82   : > { %v470_v44 = vld [vmem:[#allocation4 + $0x8] sm:$0xff]  ;;  %v469_v45 = vld [vmem:[#allocation4] sm:$0xff]  ;;  %p986_p9 = pneg %p985_p8 }
  0x83   : > { %782 = vmatmul.mubr.msk.f32.vlgmr.msra.gmra.mrb[0].mxu0 %vm311_vm0, %v317_v6  ;;  %p992_p6 = por %p991_p1, %p990_p12 }
  0x85   : > { %p993_p13 = pnand %p992_p6, %p986_p9 }
 0x156   : > { %v783_v8 = vpop.f32.mrb[0].mxu0 }
 0x157   : > { %v401_v9 = vpop.f32.mrb[1].mxu0  ;;  %v416_v11 = vsel %vm412_vm2, %v783_v8, -inf }
 0x158   : > { %v413_v10 = vsel %vm412_vm2, %v401_v9, -inf }
 0x159   : > { %414 = vmax.xlane.f32.xlu0 %v413_v10 }
 0x15d   : > { %417 = vmax.xlane.f32.xlu0 %v416_v11 }
 0x1e6   : > { %v415_v12 = vpop.xlane.xlu0 %414 }
 0x1e7   : > { %429 = vperm.xlu1 %879, %v415_v12   ;;  %v421_v27 = vsub.f32 -inf, %v415_v12 }
 0x1e9   : > { %v423_v30 = vmul.f32 1.442695, %v421_v27 }
 0x1ea   : > { %v418_v13 = vpop.xlane.xlu0 %417 }
 0x1eb   : > { %434 = vperm.xlu1 %879, %v418_v13   ;;  %v422_v26 = vsub.f32 -inf, %v418_v13 }
 0x1ed   : > { %v425_v29 = vmul.f32 1.442695, %v422_v26 }
 0x266   : > { %v430_v17 = vpop.permute.xlu1 %429 }
 0x267   : > { %v437_v18 = vsub.f32 %v401_v9, %v430_v17 }
 0x269   : > { %v439_v19 = vmul.f32 1.442695, %v437_v18 }
 0x26a   : > { %v435_v20 = vpop.permute.xlu1 %434 }
 0x26b   : > { %881 = vpow2.f32 %v439_v19  ;;  %v438_v21 = vsub.f32 %v783_v8, %v435_v20 }
 0x26d   : > { %v441_v22 = vmul.f32 1.442695, %v438_v21 }
 0x26f   : > { %883 = vpow2.f32 %v441_v22 }
 0x270   : > { %885 = vpow2.f32 %v425_v29 }
 0x271   : > { %887 = vpow2.f32 %v423_v30 }
 0x275   : > { %v882_v23 = vpop.eup %881 }
 0x276   : > { %788 = vmatprep.mubr.msk.f32.mxu1 %vm412_vm2, %v882_v23  ;;  %v457_v24 = vsel %vm412_vm2, %v882_v23, 0.0 }
 0x277   : > { %458 = vadd.xlane.f32.xlu0 %v457_v24 }
 0x279   : > { %v884_v25 = vpop.eup %883 }
 0x27a   : > { %789 = vmatmul.mubr.msk.f32.vlgmr.msra.gmra.mrb[0].mxu1 %vm412_vm2, %v884_v25  ;;  %v460_v28 = vsel %vm412_vm2, %v884_v25, 0.0  ;;  %v886_v32 = vpop.eup %885 }
 0x27b   : > { %461 = vadd.xlane.f32.xlu1 %v460_v28  ;;  %v888_v33 = vpop.eup %887 }
 0x28c   : > { %452 = vperm.xlu1 %879, %v886_v32  }
 0x28d   : > { %447 = vperm.xlu0 %880, %v888_v33  }
 0x304   : > { %v459_v34 = vpop.xlane.xlu0 %458 }
 0x308   : > { %v462_v35 = vpop.xlane.xlu1 %461 }
 0x30c   : > { %v448_v36 = vpop.permute.xlu0 %447  ;;  %v453_v37 = vpop.permute.xlu1 %452 }
 0x30d   : > { %v455_v38 = vmul.f32 0.0, %v448_v36  ;;  %v456_v39 = vmul.f32 0.0, %v453_v37  ;;  %v472_v46 = vmul.f32 %v470_v44, %v453_v37  ;;  %v471_v47 = vmul.f32 %v469_v45, %v448_v36 }
 0x30f   : > { %v463_v40 = vadd.f32 %v459_v34, %v455_v38  ;;  %v464_v41 = vadd.f32 %v462_v35, %v456_v39 }
 0x311   : > { %889 = vrcp.f32 %v463_v40 }
 0x312   : > { %891 = vrcp.f32 %v464_v41 }
 0x31b   : > { %v890_v42 = vpop.eup %889 }
 0x31c   : > { %569 = vperm.xlu0 %880, %v890_v42   ;;  %v892_v43 = vpop.eup %891 }
 0x320   : > { %574 = vperm.xlu0 %880, %v892_v43  }
 0x34d   : > { %v790_v48 = vpop.f32.mrb[0].mxu1 }
 0x34e   : > { %v555_v49 = vadd.f32 %v790_v48, %v472_v46  ;;  %v545_v50 = vpop.f32.mrb[1].mxu1 }
 0x34f   : > { %v554_v51 = vadd.f32 %v545_v50, %v471_v47 }
 0x350   : > { %557 = vst.msk [vmem:[#allocation4 + $0x8] sm:$0xff] %vm311_vm0, %v555_v49 }
 0x351   : > { %556 = vst.msk [vmem:[#allocation4] sm:$0xff] %vm311_vm0, %v554_v51 }
 0x357   : > { %v566_v56 = vld [vmem:[#allocation4 + $0x8] sm:$0xff] }
 0x358   : > { %v565_v53 = vld [vmem:[#allocation4] sm:$0xff] }
 0x39b   : > { %v570_v52 = vpop.permute.xlu0 %569 }
 0x39c   : > { %v577_v54 = vmul.f32 %v570_v52, %v565_v53 }
 0x39e   : > { %579 = vst.msk [vmem:[%s298_s24] sm:$0xff] %vm311_vm0, %v577_v54 }
 0x39f   : > { %v575_v55 = vpop.permute.xlu0 %574 }
 0x3a0   : > { %v578_v57 = vmul.f32 %v575_v55, %v566_v56 }
 0x3a2   : > { %580 = vst.msk [vmem:[%s298_s24 + $0x8] sm:$0xff] %vm311_vm0, %v578_v57 }
 0x3a3   : > { %996 = shalt.err (!%p993_p13)
}
 0x3a4   : > { %s997_s28 = scalar_lea.hbm %s1351_s30, 256  ;;  %s1001_s10 = scalar_lea.hbm %s1404_s3, 512 }
 0x3a5   : > { %p998_p11 = scmp.ne.s32.totalorder %s1351_s30, %s997_s28  ;;  %p1002_p7 = scmp.lt.u32.totalorder %s1351_s30, %s1404_s3 }
 0x3a6   : > { %p1003_p4 = scmp.lt.u32.totalorder %s1001_s10, %s997_s28  ;;  %p1005_p0 = scmp.lt.u32.totalorder %s997_s28, %s1351_s30 }
 0x3a7   : > { %p999_p2 = pnand %p998_p11, %p1433_p10 }
 0x3a8   : > { %p1004_p3 = por %p1003_p4, %p1002_p7 }
 0x3a9   : > { %p1000_p5 = pneg %p999_p2 }
 0x3aa   : > { %p1006_p8 = por %p1005_p0, %p1004_p3 }
 0x3ac   : > { %p1007_p9 = pnand %p1006_p8, %p1000_p5 }
 0x3ae   : > { %1010 = shalt.err (!%p1007_p9)
}
 0x3af   : > { %s1079_s11 = smov 128   ;;  %s1080_s19 = smov 8  }
 0x3b0   : > { %807 = dma.vmem_to_hbm [thread:$0]  (%p1433_p10), %s1345_s16, 256, %s1351_s30, %s582_s6, %s1079_s11, %s1079_s11, %s1080_s19  }
 0x3b1 PF: > { %s612_s9 = sand.u32 1, %s1049_s12   ;;  %p1434_p12 = scmp.ne.s32.totalorder %s1421_s27, 0 }
 0x3b2   : > { %p1435_p1 = scmp.ge.s32.totalorder %s1069_s17, 2  ;;  %s613_s18 = scalar_lea.sflag [#allocation7], %s612_s9 }
 0x3b4   : > { %p820_p6 = pnand %p1435_p1, %p1434_p12 }
 0x3b6   : > { %1044 = dma.done.wait (!%p820_p6), %s613_s18, 256  }
 0x3b7   : > { %1046 = vsyncadd (!%p820_p6), %s613_s18, 4294967040  ;;  %s22_s17 = sadd.s32 1, %s1069_s17   ;;  %s1436_s24 = sld [smem:[#allocation17_spill]] }
 0x3b8   : > { %p19_p13 = scmp.ge.s32.totalorder %s22_s17, 4   ;;  %s1437_s15 = sld [smem:[#allocation15_spill]] }
 0x3b9   : > { %s1438_s16 = sld [smem:[#allocation16_spill]]  ;;  %s1439_s12 = smov %s1053_s13 }
 0x3ba   : > { %s1440_s13 = smov %s1057_s14  ;;  %21 = sbr.rel (!%p19_p13) target bundleno = 10 (0xa), region = 109 }
 0x3bd   : > { %s1441_s14 = smov %s1436_s24 }
 0x3c1   :  { %618 = vsyncpa [#allocation6], 1 }
 0x3c2   :  { %620 = vsyncpa [#allocation6 + $0x1], 1 }
 0x3c3   :  { %621 = vsyncpa [#allocation9], 1 }
 0x3c4   :  { %623 = vsyncpa [#allocation9 + $0x1], 1 }
 0x3c5   :  { %624 = vsyncpa [#allocation7], 1 }
 0x3c6   :  { %626 = vsyncpa [#allocation7 + $0x1], 1 }

</bundles_post_ra>
